<compile_context>
chip_gen: v6e
topology: v6e:2x2x1
jax: 0.10.0
libtpu: 0.0.40
codegen_flags: <defaults>
</compile_context>

<pallas_src>
import functools
import math

import jax
import jax.numpy as jnp
from jax import lax
from jax.experimental import pallas as pl
from jax.experimental.pallas import tpu as pltpu


_VMEM_LIMIT = 32 * 1024 * 1024  # >= every generation's scoped default, <= v7x physical


# ---------------- host-side (static) tile / block selection -----------------

def _pass1_tile(c_in, hw, x_itemsize, weight_bytes):
    """Spatial tile for the pooling pass.  Keeps 2 pipelined x buffers + the
    f32 accumulator + the (double-buffered) weights well under v5e's 16 MiB
    scoped-VMEM default."""
    budget = max(10 * 1024 * 1024 - weight_bytes, 2 * 1024 * 1024)
    col_bytes = c_in * (2 * x_itemsize + 4)          # 2 x buffers + f32 scratch column
    if hw <= 128 or hw * col_bytes <= budget:
        return hw                                    # single full-row tile, no mask
    tile = max(128, min((hw // 128) * 128, (budget // col_bytes) // 128 * 128))
    for cand in range(tile, 511, -128):              # prefer a divisor of hw
        if hw % cand == 0:                           # (no ragged last tile)
            return cand
    return tile


def _pass2_blocks(c, hw, itemsize, budget=2 * 1024 * 1024):
    """(channel_block, spatial_tile) for the gate-multiply pass."""
    c_min = min(c, 8)
    if hw <= 128 or hw * c_min * itemsize <= budget:
        tile = hw
    else:
        max_tile = max(128, (budget // (c_min * itemsize)) // 128 * 128)
        tile = min((hw // 128) * 128, max_tile)
        for cand in range(tile, 511, -128):          # prefer a divisor of hw
            if hw % cand == 0:
                tile = cand
                break
    max_c = max(1, budget // (tile * itemsize))
    if max_c >= c:
        c_blk = c
    else:
        c_blk = max(8, (max_c // 8) * 8)
        for cand in range(c_blk, 7, -8):             # prefer a divisor of c
            if c % cand == 0:
                c_blk = cand
                break
    return c_blk, tile


# ---------------- pass 1: streaming spatial sum + fused squeeze MLP ---------

def _pool_gate_kernel(x_ref, wr_ref, br_ref, we_ref, be_ref, gate_ref, acc_ref,
                      *, hw, tile, n_tiles, ragged):
    t = pl.program_id(1)

    @pl.when(t == 0)
    def _():
        acc_ref[...] = jnp.zeros_like(acc_ref)

    def _accumulate(mask_tail):
        v = x_ref[...].astype(jnp.float32)
        if mask_tail:                                # only the last (ragged) tile
            col = lax.broadcasted_iota(jnp.int32, v.shape, 2) + t * tile
            v = jnp.where(col < hw, v, 0.0)
        acc_ref[...] += v                            # pure VALU adds; no per-tile XLU

    if ragged:
        @pl.when(t < n_tiles - 1)
        def _():
            _accumulate(False)

        @pl.when(t == n_tiles - 1)
        def _():
            _accumulate(True)
    else:
        _accumulate(False)

    # Epilogue: single cross-lane reduce + tiny fused squeeze MLP -> gate.
    @pl.when(t == n_tiles - 1)
    def _():
        sums = jnp.sum(acc_ref[...], axis=2, keepdims=True)        # (1, C_in, 1)
        pooled = sums[0] * (1.0 / hw)                               # (C_in, 1) column
        y = jnp.dot(wr_ref[...], pooled,
                    preferred_element_type=jnp.float32) + br_ref[...]   # (C_sq, 1)
        y = y * jax.nn.sigmoid(y)                                   # swish
        y = jnp.dot(we_ref[...], y,
                    preferred_element_type=jnp.float32) + be_ref[...]   # (C_out, 1)
        gate_ref[...] = jax.nn.sigmoid(y)[None, :, :]               # (1, C_out, 1)


def _pool_and_gate(x, w_r, b_r, w_e, b_e):
    """x: (N, C_in, HW) -> gate (N, C_out, 1) float32."""
    N, C_in, HW = x.shape
    C_sq = w_r.shape[0]
    C_out = w_e.shape[0]
    weight_bytes = 2 * 4 * int(w_r.size + b_r.size + w_e.size + b_e.size)
    tile = _pass1_tile(C_in, HW, x.dtype.itemsize, weight_bytes)
    n_tiles = (HW + tile - 1) // tile
    ragged = (HW % tile) != 0
    kernel = functools.partial(_pool_gate_kernel, hw=HW, tile=tile,
                               n_tiles=n_tiles, ragged=ragged)
    return pl.pallas_call(
        kernel,
        out_shape=jax.ShapeDtypeStruct((N, C_out, 1), jnp.float32),
        grid_spec=pltpu.PrefetchScalarGridSpec(
            num_scalar_prefetch=0,
            grid=(N, n_tiles),
            in_specs=[
                pl.BlockSpec((1, C_in, tile), lambda b, t: (b, 0, t)),
                pl.BlockSpec((C_sq, C_in), lambda b, t: (0, 0)),
                pl.BlockSpec((C_sq, 1), lambda b, t: (0, 0)),
                pl.BlockSpec((C_out, C_sq), lambda b, t: (0, 0)),
                pl.BlockSpec((C_out, 1), lambda b, t: (0, 0)),
            ],
            out_specs=pl.BlockSpec((1, C_out, 1), lambda b, t: (b, 0, 0)),
            scratch_shapes=[pltpu.VMEM((1, C_in, tile), jnp.float32)],
        ),
        compiler_params=pltpu.CompilerParams(
            dimension_semantics=("parallel", "arbitrary"),
            vmem_limit_bytes=_VMEM_LIMIT),
        cost_estimate=pl.CostEstimate(
            flops=int(N * (C_in * HW + 2 * (C_sq * C_in + C_out * C_sq))),
            transcendentals=int(2 * N * (C_sq + C_out)),
            bytes_accessed=int(x.size * x.dtype.itemsize + weight_bytes // 2
                               + N * C_out * 4)),
    )(x, w_r, b_r, w_e, b_e)


# ---------------- pass 2: streaming per-channel gate multiply ---------------

def _apply_gate_kernel(gate_ref, z_ref, out_ref):
    # gate (1, c_blk, 1) broadcasts along the lane (spatial) axis; multiply in
    # the activation dtype (bf16-native VALUs on v6e/v7x; exact for f32).
    out_ref[...] = z_ref[...] * gate_ref[...].astype(z_ref.dtype)


def _apply_gate(gate, z):
    """gate: (N, C_out, 1) f32, z: (N, C_out, HW) -> (N, C_out, HW) in z.dtype."""
    N, C_out, HW = z.shape
    c_blk, tile = _pass2_blocks(C_out, HW, z.dtype.itemsize)
    grid = (N, (C_out + c_blk - 1) // c_blk, (HW + tile - 1) // tile)
    return pl.pallas_call(
        _apply_gate_kernel,
        out_shape=jax.ShapeDtypeStruct((N, C_out, HW), z.dtype),
        grid_spec=pltpu.PrefetchScalarGridSpec(
            num_scalar_prefetch=0,
            grid=grid,
            in_specs=[
                pl.BlockSpec((1, c_blk, 1), lambda b, c, t: (b, c, 0)),
                pl.BlockSpec((1, c_blk, tile), lambda b, c, t: (b, c, t)),
            ],
            out_specs=pl.BlockSpec((1, c_blk, tile), lambda b, c, t: (b, c, t)),
        ),
        compiler_params=pltpu.CompilerParams(
            dimension_semantics=("parallel", "parallel", "parallel"),
            vmem_limit_bytes=_VMEM_LIMIT),
        cost_estimate=pl.CostEstimate(
            flops=int(N * C_out * HW),
            transcendentals=0,
            bytes_accessed=int(2 * z.size * z.dtype.itemsize + gate.size * 4)),
    )(gate, z)


# ---------------- full module forward ---------------------------------------

def se_module_diff(x_nchw, z_nchw, w_reduce, b_reduce, w_expand, b_expand):
    """x_nchw: (N, C_in, H, W), z_nchw: (N, C_out, Hz, Wz).

    Conv-style weight layout: w_reduce (C_sq, C_in), b_reduce (C_sq, 1),
    w_expand (C_out, C_sq), b_expand (C_out, 1).
    Returns (N, C_out, Hz, Wz) in z's dtype.  (Avg_size == 1 path.)
    """
    N, C_in, H, W = x_nchw.shape
    _, C_out, Hz, Wz = z_nchw.shape

    # Pure reshapes only -- spatial axis stays lane-dense, no NCHW<->NHWC copies.
    x = x_nchw.reshape(N, C_in, H * W)
    z = z_nchw.reshape(N, C_out, Hz * Wz)

    gate = _pool_and_gate(x, w_reduce, b_reduce, w_expand, b_expand)  # (N,C_out,1) f32
    out = _apply_gate(gate, z)                                        # (N,C_out,Hz*Wz)
    return out.reshape(N, C_out, Hz, Wz)


def init_params(key, inp, oup, se_ratio=1):
    """Deterministic init mirroring reset_parameters():
       conv weight ~ N(0, sqrt(2/n)) with n = k*k*out_channels, bias = 0."""
    c_sq = max(1, int(inp / se_ratio))
    k_r, k_e = jax.random.split(key)
    std_r = math.sqrt(2.0 / (1 * 1 * c_sq))
    std_e = math.sqrt(2.0 / (1 * 1 * oup))
    # conv layout (out_channels, in_channels); gate MLP runs on column vectors.
    w_reduce = std_r * jax.random.normal(k_r, (c_sq, inp), dtype=jnp.float32)
    b_reduce = jnp.zeros((c_sq, 1), dtype=jnp.float32)
    w_expand = std_e * jax.random.normal(k_e, (oup, c_sq), dtype=jnp.float32)
    b_expand = jnp.zeros((oup, 1), dtype=jnp.float32)
    return w_reduce, b_reduce, w_expand, b_expand


def _reference(x, z, w_r, b_r, w_e, b_e):
    # Pure-JAX reference of the PyTorch forward (Avg_size == 1).
    pooled = jnp.mean(x, axis=(2, 3))                        # (N, C_in)
    y = pooled @ w_r.T + b_r[:, 0]                           # (N, C_sq)
    y = y * jax.nn.sigmoid(y)
    y = y @ w_e.T + b_e[:, 0]                                # (N, C_out)
    gate = jax.nn.sigmoid(y)[:, :, None, None]               # (N, C_out, 1, 1)
    return gate * z


if __name__ == "__main__":
    N, C_IN, C_OUT, H, W = 2, 4, 4, 16, 16

    key = jax.random.PRNGKey(0)
    kx, kz, kp = jax.random.split(key, 3)
    x = jax.random.normal(kx, (N, C_IN, H, W), dtype=jnp.float32)
    z = jax.random.normal(kz, (N, C_OUT, H, W), dtype=jnp.float32)

    w_r, b_r, w_e, b_e = init_params(kp, C_IN, C_OUT, se_ratio=1)

    se_fn = jax.jit(se_module_diff)
    out = se_fn(x, z, w_r, b_r, w_e, b_e)
    out = jax.block_until_ready(out)

    ref = _reference(x, z, w_r, b_r, w_e, b_e)
    assert out.shape == (N, C_OUT, H, W)
    assert jnp.allclose(out, ref, atol=1e-5, rtol=1e-5), "mismatch vs reference"

    print("KERNEL_OK")
</pallas_src>

<mosaic_0001>
module attributes {stable_mosaic.version = 11 : i64} {
  func.func @_pool_gate_kernel(%arg0: i32, %arg1: i32, %arg2: memref<1x4x256xf32, #tpu.memory_space<vmem>>, %arg3: memref<4x4xf32, #tpu.memory_space<vmem>>, %arg4: memref<4x1xf32, #tpu.memory_space<vmem>>, %arg5: memref<4x4xf32, #tpu.memory_space<vmem>>, %arg6: memref<4x1xf32, #tpu.memory_space<vmem>>, %arg7: memref<1x4x1xf32, #tpu.memory_space<vmem>>, %arg8: memref<1x4x256xf32, #tpu.memory_space<vmem>>) attributes {dimension_semantics = [#tpu.dimension_semantics<parallel>, #tpu.dimension_semantics<arbitrary>], iteration_bounds = array<i64: 2, 1>, scalar_prefetch = 0 : i64, scratch_operands = 1 : i64, tpu.core_type = #tpu.core_type<tc>, window_params = [{transform_indices = @transform_0, window_bounds = array<i64: 1, 4, 256>}, {pipeline_mode = #tpu.pipeline_mode<synchronous>, transform_indices = @transform_1, window_bounds = array<i64: 4, 4>}, {pipeline_mode = #tpu.pipeline_mode<synchronous>, transform_indices = @transform_2, window_bounds = array<i64: 4, 1>}, {pipeline_mode = #tpu.pipeline_mode<synchronous>, transform_indices = @transform_3, window_bounds = array<i64: 4, 4>}, {pipeline_mode = #tpu.pipeline_mode<synchronous>, transform_indices = @transform_4, window_bounds = array<i64: 4, 1>}, {transform_indices = @transform_5, window_bounds = array<i64: 1, 4, 1>}]} {
    %c0_i32 = arith.constant 0 : i32
    %0 = arith.cmpi eq, %arg1, %c0_i32 : i32
    %1 = arith.extui %0 : i1 to i32
    %c0_i32_0 = arith.constant 0 : i32
    %2 = arith.cmpi ne, %1, %c0_i32_0 : i32
    scf.if %2 {
      %cst = arith.constant 0.000000e+00 : f32
      %10 = vector.broadcast %cst : f32 to vector<1x4x256xf32>
      %c0_11 = arith.constant 0 : index
      %c0_12 = arith.constant 0 : index
      %c0_13 = arith.constant 0 : index
      %11 = vector.load %arg8[%c0_11, %c0_12, %c0_13] : memref<1x4x256xf32, #tpu.memory_space<vmem>>, vector<1x4x256xf32>
      tpu.vector_store %arg8[%c0_11, %c0_12, %c0_13], %10 {strides = array<i32>} : memref<1x4x256xf32, #tpu.memory_space<vmem>>, vector<1x4x256xf32>,
    } else {
    }
    %c0 = arith.constant 0 : index
    %c0_1 = arith.constant 0 : index
    %c0_2 = arith.constant 0 : index
    %3 = vector.load %arg2[%c0, %c0_1, %c0_2] : memref<1x4x256xf32, #tpu.memory_space<vmem>>, vector<1x4x256xf32>
    %c0_3 = arith.constant 0 : index
    %c0_4 = arith.constant 0 : index
    %c0_5 = arith.constant 0 : index
    %4 = vector.load %arg8[%c0_3, %c0_4, %c0_5] : memref<1x4x256xf32, #tpu.memory_space<vmem>>, vector<1x4x256xf32>
    %5 = arith.addf %4, %3 : vector<1x4x256xf32>
    %c0_6 = arith.constant 0 : index
    %c0_7 = arith.constant 0 : index
    %c0_8 = arith.constant 0 : index
    %6 = vector.load %arg8[%c0_6, %c0_7, %c0_8] : memref<1x4x256xf32, #tpu.memory_space<vmem>>, vector<1x4x256xf32>
    tpu.vector_store %arg8[%c0_6, %c0_7, %c0_8], %5 {strides = array<i32>} : memref<1x4x256xf32, #tpu.memory_space<vmem>>, vector<1x4x256xf32>,
    %c0_i32_9 = arith.constant 0 : i32
    %7 = arith.cmpi eq, %arg1, %c0_i32_9 : i32
    %8 = arith.extui %7 : i1 to i32
    %c0_i32_10 = arith.constant 0 : i32
    %9 = arith.cmpi ne, %8, %c0_i32_10 : i32
    scf.if %9 {
      %c0_11 = arith.constant 0 : index
      %c0_12 = arith.constant 0 : index
      %c0_13 = arith.constant 0 : index
      %10 = vector.load %arg8[%c0_11, %c0_12, %c0_13] : memref<1x4x256xf32, #tpu.memory_space<vmem>>, vector<1x4x256xf32>
      %cst = arith.constant dense<0.000000e+00> : vector<1x4xf32>
      %11 = vector.multi_reduction <add>, %10, %cst [2] : vector<1x4x256xf32> to vector<1x4xf32>
      %12 = vector.shape_cast %11 : vector<1x4xf32> to vector<1x4x1xf32>
      %13 = vector.shape_cast %12 : vector<1x4x1xf32> to vector<4x1xf32>
      %cst_14 = arith.constant 3.906250e-03 : f32
      %14 = vector.broadcast %cst_14 : f32 to vector<4x1xf32>
      %15 = arith.mulf %13, %14 : vector<4x1xf32>
      %c0_15 = arith.constant 0 : index
      %c0_16 = arith.constant 0 : index
      %16 = vector.load %arg3[%c0_15, %c0_16] : memref<4x4xf32, #tpu.memory_space<vmem>>, vector<4x4xf32>
      %cst_17 = arith.constant dense<0.000000e+00> : vector<4x1xf32>
      %17 = tpu.matmul %16, %15, %cst_17 {dimension_numbers = #tpu.dot_dimension_numbers<[1], [0], [0], [1], [0, 0, 1, 1], [], []>} : vector<4x4xf32>, vector<4x1xf32>, vector<4x1xf32> -> vector<4x1xf32>
      %c0_18 = arith.constant 0 : index
      %c0_19 = arith.constant 0 : index
      %18 = vector.load %arg4[%c0_18, %c0_19] : memref<4x1xf32, #tpu.memory_space<vmem>>, vector<4x1xf32>
      %19 = arith.addf %17, %18 : vector<4x1xf32>
      %20 = arith.negf %19 : vector<4x1xf32>
      %21 = math.exp %20 : vector<4x1xf32>
      %cst_20 = arith.constant 1.000000e+00 : f32
      %22 = vector.broadcast %cst_20 : f32 to vector<4x1xf32>
      %23 = arith.addf %22, %21 : vector<4x1xf32>
      %24 = arith.divf %22, %23 : vector<4x1xf32>
      %25 = arith.mulf %19, %24 : vector<4x1xf32>
      %c0_21 = arith.constant 0 : index
      %c0_22 = arith.constant 0 : index
      %26 = vector.load %arg5[%c0_21, %c0_22] : memref<4x4xf32, #tpu.memory_space<vmem>>, vector<4x4xf32>
      %cst_23 = arith.constant dense<0.000000e+00> : vector<4x1xf32>
      %27 = tpu.matmul %26, %25, %cst_23 {dimension_numbers = #tpu.dot_dimension_numbers<[1], [0], [0], [1], [0, 0, 1, 1], [], []>} : vector<4x4xf32>, vector<4x1xf32>, vector<4x1xf32> -> vector<4x1xf32>
      %c0_24 = arith.constant 0 : index
      %c0_25 = arith.constant 0 : index
      %28 = vector.load %arg6[%c0_24, %c0_25] : memref<4x1xf32, #tpu.memory_space<vmem>>, vector<4x1xf32>
      %29 = arith.addf %27, %28 : vector<4x1xf32>
      %30 = arith.negf %29 : vector<4x1xf32>
      %31 = math.exp %30 : vector<4x1xf32>
      %cst_26 = arith.constant 1.000000e+00 : f32
      %32 = vector.broadcast %cst_26 : f32 to vector<4x1xf32>
      %33 = arith.addf %32, %31 : vector<4x1xf32>
      %34 = arith.divf %32, %33 : vector<4x1xf32>
      %35 = vector.shape_cast %34 : vector<4x1xf32> to vector<1x4x1xf32>
      %c0_27 = arith.constant 0 : index
      %c0_28 = arith.constant 0 : index
      %c0_29 = arith.constant 0 : index
      %36 = vector.load %arg7[%c0_27, %c0_28, %c0_29] : memref<1x4x1xf32, #tpu.memory_space<vmem>>, vector<1x4x1xf32>
      tpu.vector_store %arg7[%c0_27, %c0_28, %c0_29], %35 {strides = array<i32>} : memref<1x4x1xf32, #tpu.memory_space<vmem>>, vector<1x4x1xf32>,
    } else {
    }
    return
  }
  func.func @transform_0(%arg0: i32, %arg1: i32) -> (i32, i32, i32) {
    %c0_i32 = arith.constant 0 : i32
    %c0_i32_0 = arith.constant 0 : i32
    return %arg0, %c0_i32, %arg1 : i32, i32, i32
  }
  func.func @transform_1(%arg0: i32, %arg1: i32) -> (i32, i32) {
    %c0_i32 = arith.constant 0 : i32
    %c0_i32_0 = arith.constant 0 : i32
    %c0_i32_1 = arith.constant 0 : i32
    return %c0_i32, %c0_i32_0 : i32, i32
  }
  func.func @transform_2(%arg0: i32, %arg1: i32) -> (i32, i32) {
    %c0_i32 = arith.constant 0 : i32
    %c0_i32_0 = arith.constant 0 : i32
    %c0_i32_1 = arith.constant 0 : i32
    return %c0_i32, %c0_i32_0 : i32, i32
  }
  func.func @transform_3(%arg0: i32, %arg1: i32) -> (i32, i32) {
    %c0_i32 = arith.constant 0 : i32
    %c0_i32_0 = arith.constant 0 : i32
    %c0_i32_1 = arith.constant 0 : i32
    return %c0_i32, %c0_i32_0 : i32, i32
  }
  func.func @transform_4(%arg0: i32, %arg1: i32) -> (i32, i32) {
    %c0_i32 = arith.constant 0 : i32
    %c0_i32_0 = arith.constant 0 : i32
    %c0_i32_1 = arith.constant 0 : i32
    return %c0_i32, %c0_i32_0 : i32, i32
  }
  func.func @transform_5(%arg0: i32, %arg1: i32) -> (i32, i32, i32) {
    %c0_i32 = arith.constant 0 : i32
    %c0_i32_0 = arith.constant 0 : i32
    %c0_i32_1 = arith.constant 0 : i32
    return %arg0, %c0_i32, %c0_i32_0 : i32, i32, i32
  }
}

module attributes {stable_mosaic.version = 11 : i64} {
  func.func @_apply_gate_kernel(%arg0: i32, %arg1: i32, %arg2: i32, %arg3: memref<1x4x1xf32, #tpu.memory_space<vmem>>, %arg4: memref<1x4x256xf32, #tpu.memory_space<vmem>>, %arg5: memref<1x4x256xf32, #tpu.memory_space<vmem>>) attributes {dimension_semantics = [#tpu.dimension_semantics<parallel>, #tpu.dimension_semantics<parallel>, #tpu.dimension_semantics<parallel>], iteration_bounds = array<i64: 2, 1, 1>, scalar_prefetch = 0 : i64, scratch_operands = 0 : i64, tpu.core_type = #tpu.core_type<tc>, window_params = [{transform_indices = @transform_0, window_bounds = array<i64: 1, 4, 1>}, {transform_indices = @transform_1, window_bounds = array<i64: 1, 4, 256>}, {transform_indices = @transform_2, window_bounds = array<i64: 1, 4, 256>}]} {
    %c0 = arith.constant 0 : index
    %c0_0 = arith.constant 0 : index
    %c0_1 = arith.constant 0 : index
    %0 = vector.load %arg4[%c0, %c0_0, %c0_1] : memref<1x4x256xf32, #tpu.memory_space<vmem>>, vector<1x4x256xf32>
    %c0_2 = arith.constant 0 : index
    %c0_3 = arith.constant 0 : index
    %c0_4 = arith.constant 0 : index
    %1 = vector.load %arg3[%c0_2, %c0_3, %c0_4] : memref<1x4x1xf32, #tpu.memory_space<vmem>>, vector<1x4x1xf32>
    %2 = vector.broadcast %1 : vector<1x4x1xf32> to vector<1x4x256xf32>
    %3 = arith.mulf %0, %2 : vector<1x4x256xf32>
    %c0_5 = arith.constant 0 : index
    %c0_6 = arith.constant 0 : index
    %c0_7 = arith.constant 0 : index
    %4 = vector.load %arg5[%c0_5, %c0_6, %c0_7] : memref<1x4x256xf32, #tpu.memory_space<vmem>>, vector<1x4x256xf32>
    tpu.vector_store %arg5[%c0_5, %c0_6, %c0_7], %3 {strides = array<i32>} : memref<1x4x256xf32, #tpu.memory_space<vmem>>, vector<1x4x256xf32>,
    return
  }
  func.func @transform_0(%arg0: i32, %arg1: i32, %arg2: i32) -> (i32, i32, i32) {
    %c0_i32 = arith.constant 0 : i32
    %c0_i32_0 = arith.constant 0 : i32
    return %arg0, %arg1, %c0_i32 : i32, i32, i32
  }
  func.func @transform_1(%arg0: i32, %arg1: i32, %arg2: i32) -> (i32, i32, i32) {
    %c0_i32 = arith.constant 0 : i32
    return %arg0, %arg1, %arg2 : i32, i32, i32
  }
  func.func @transform_2(%arg0: i32, %arg1: i32, %arg2: i32) -> (i32, i32, i32) {
    %c0_i32 = arith.constant 0 : i32
    return %arg0, %arg1, %arg2 : i32, i32, i32
  }
}

</mosaic_0001>

<bundles_post_ra>
// kernel: se_module_diff.3
= control target key start
LH: loop header
LB: loop body
LE: loop exit
PB: predicated region body
PF: predicated region fallthrough
CT: control target
= control target key end

     0   :  { %s467_s9 = smov 0   ;;  %s469_s10 = smov 0   ;;  %s500_s0 = inlined_call_operand.vmem [shape: f32[2,4,1], index: 0, kind: input, shape index: {}]   ;;  %s501_s1 = inlined_call_operand.vmem [shape: f32[2,4,256], index: 1, kind: input, shape index: {}]   ;;  %s502_s2 = inlined_call_operand.vmem [shape: f32[2,4,256], index: 2, kind: output, shape index: {}]  }
   0x1   :  { %s471_s11 = smov 0  }
   0x2 LB: > { %s31_s12 = sadd.s32 1, %s444_s10  ;;  %p389_p0 = scmp.ge.s32.totalorder %s448_s11, 1  ;;  %s448_s11 = sphi %s471_s11, %s12_s11   ;;  %s444_s10 = sphi %s469_s10, %s504_s10   ;;  %s440_s9 = sphi %s467_s9, %s503_s9  }
   0x3   : > { %p33_p1 = scmp.ge.s32.totalorder %s31_s12, 2  ;;  %p162_p2 = scmp.lt.s32.totalorder %s448_s11, 3 }
   0x5   : > { %s506_s12 = smov (%p33_p1, %s31_s12), 0  ;;  %p163_p3 = pnand %p389_p0, %p162_p2 }
   0x6   : > { %p207_p4 = scmp.lt.s32.totalorder (!%p163_p3), %s440_s9, 1 }
   0x7   : > { %166 = sbr.rel (%p163_p3) target bundleno = 145 (0x91), region = 28 }
   0xc   : > { %v450_v0 = vmov 0   ;;  %s508_s9 = smov (!%p207_p4, %s440_s9), 1  ;;  %v451_v2 = vmov 839922192   ;;  %v251_v4 = vlaneseq }
   0xd   : > { %425 = vset.pattern.permute.xlu0 %v450_v0  ;;  %s390_s13 = sshll.u32 %s508_s9, 2  ;;  %v249_v3 = vunpack.c.l.s4 %v451_v2  ;;  %s397_s17 = sshll.u32 %s508_s9, 3 }
   0xe   : > { %s213_s16 = scalar_lea.vmem %s500_s0, %s390_s13  ;;  %v252_v6 = vshrl.u32 %v251_v4, 7  ;;  %s226_s20 = scalar_lea.vmem %s501_s1, %s397_s17 }
   0xf   : > { %v243_v1 = vld [vmem:[%s213_s16] sm:$0xf]  ;;  %v250_v5 = vunpack.c.0.s8 %v249_v3  ;;  %s240_s23 = scalar_lea.vmem %s502_s2, %s397_s17 }
  0x10   : > { %246 = vperm.xlu0 %425, %v243_v1   ;;  %v242_v8 = vld [vmem:[%s226_s20] sm:$0xff] }
  0x11   : > { %v253_v7 = vsub.s32 %v250_v5, %v252_v6 }
  0x8b   : > { %v247_v9 = vpop.permute.xlu0 %246 }
  0x8c   : > { %v254_v10 = vrot.slane %v247_v9, %v253_v7 }
  0x8e   : > { %v256_v11 = vmul.f32 %v254_v10, %v242_v8 }
  0x90   : > { %257 = vst [vmem:[%s240_s23] sm:$0xff] %v256_v11 }
  0x91 PF: > { %s12_s11 = sadd.s32 1, %s448_s11   ;;  %s503_s9 = smov %s444_s10 }
  0x92   : > { %p9_p5 = scmp.ge.s32.totalorder %s12_s11, 4   ;;  %s504_s10 = smov %s506_s12 }
  0x94   :  { %11 = sbr.rel (!%p9_p5) target bundleno = 2 (0x2), region = 61 }

// kernel: se_module_diff.2
= control target key start
LH: loop header
LB: loop body
LE: loop exit
PB: predicated region body
PF: predicated region fallthrough
CT: control target
= control target key end

     0   :  { %s635_s18 = smov 0   ;;  %s637_s19 = smov 0   ;;  %s690_s0 = inlined_call_operand.vmem [shape: f32[2,4,256], index: 0, kind: input, shape index: {}]   ;;  %s691_s1 = inlined_call_operand.vmem [shape: f32[4,4], index: 1, kind: input, shape index: {}]   ;;  %s692_s2 = inlined_call_operand.vmem [shape: f32[4,1], index: 2, kind: input, shape index: {}]   ;;  %s693_s3 = inlined_call_operand.vmem [shape: f32[4,4], index: 3, kind: input, shape index: {}]   ;;  %s694_s4 = inlined_call_operand.vmem [shape: f32[4,1], index: 4, kind: input, shape index: {}]   ;;  %s695_s5 = inlined_call_operand.vmem [shape: f32[2,4,1], index: 5, kind: output, shape index: {}]  }
   0x1   :  { %s639_s20 = smov 0  }
   0x2 LB: > { %s27_s21 = sadd.s32 1, %s597_s19  ;;  %p517_p0 = scmp.ge.s32.totalorder %s601_s20, 1  ;;  %s601_s20 = sphi %s639_s20, %s15_s20   ;;  %s597_s19 = sphi %s637_s19, %s697_s19   ;;  %s593_s18 = sphi %s635_s18, %s696_s18  }
   0x3   : > { %p29_p1 = scmp.ge.s32.totalorder %s27_s21, 2  ;;  %p206_p2 = scmp.lt.s32.totalorder %s601_s20, 3 }
   0x5   : > { %s699_s21 = smov (%p29_p1, %s27_s21), 0  ;;  %p207_p3 = pnand %p517_p0, %p206_p2 }
   0x6   : > { %p238_p4 = scmp.lt.s32.totalorder (!%p207_p3), %s593_s18, 1 }
   0x7   : > { %210 = sbr.rel (%p207_p3) target bundleno = 620 (0x26c), region = 40 }
   0xc   : > { %s701_s18 = smov (!%p238_p4, %s593_s18), 1  ;;  %vm267_vm0 = vcmask 1043456   ;;  %v603_v5 = vmov 0.0   ;;  %vm604_vm1 = vmmov 0   ;;  %v274_v8 = vld [vmem:[%s691_s1] sm:$0xf] }
   0xd   : > { %s529_s22 = sshll.u32 %s701_s18, 3  ;;  %534 = vmatprep.subr.mxu0 %v603_v5  ;;  %539 = vmatprep.subr.mxu1 %v603_v5  ;;  %vm276_vm2 = vcmask 31744   ;;  %v275_v9 = vld [vmem:[%s692_s2] sm:$0xf]  ;;  %s520_s9 = sshll.u32 %s701_s18, 2  ;;  %vm444_vm3 = vcmask 3072  }
   0xe   : > { %s245_s25 = scalar_lea.vmem %s690_s0, %s529_s22  ;;  %536 = vmatprep.mubr.msk.f32.mxu0 %vm604_vm1, %v603_v5  ;;  %541 = vmatprep.mubr.msk.f32.mxu1 %vm604_vm1, %v603_v5  ;;  %v360_v18 = vld [vmem:[%s693_s3] sm:$0xf]  ;;  %s250_s12 = scalar_lea.vmem %s695_s5, %s520_s9 }
   0xf   : > { %v256_v0 = vld [vmem:[%s245_s25] sm:$0xff] }
  0x10   : > { %v265_v1 = vcombine.high %v256_v0, %v256_v0  ;;  %v268_v2 = vsel %vm267_vm0, %v256_v0, 0.0  ;;  %v361_v19 = vld [vmem:[%s694_s4] sm:$0xf] }
  0x12   : > { %v269_v3 = vsel %vm267_vm0, %v265_v1, 0.0 }
  0x13   : > { %v270_v4 = vadd.f32 %v269_v3, %v268_v2 }
  0x15   : > { %271 = vadd.xlane.f32.xlu0 %v270_v4 }
  0x9e   : > { %v272_v6 = vpop.xlane.xlu0 %271 }
  0x9f   : > { %v273_v7 = vmul.f32 0.00390625, %v272_v6 }
  0xa1   : > { %535 = vmatpush3.msk.msra.mxu0 %vm267_vm0, %v273_v7 }
  0xa2   : > { %537 = vmatmul.mubr.msk.f32.vlgmr.msra.gmra.mxu0 %vm276_vm2, %v274_v8 }
 0x162   : > { %v349_v10 = vpop.f32.mrf.mxu0 }
 0x163   : > { %v350_v11 = vadd.f32 %v349_v10, %v275_v9 }
 0x164   : > { %v538_v12 = vpop.f32.mrf.mxu0 }
 0x165   : > { %v523_v13 = vmul.f32 -1.442695, %v350_v11 }
 0x167   : > { %571 = vpow2.f32 %v523_v13 }
 0x174   : > { %v572_v14 = vpop.eup %571 }
 0x175   : > { %v356_v15 = vadd.f32 1.0, %v572_v14 }
 0x177   : > { %573 = vrcp.f32 %v356_v15 }
 0x184   : > { %v574_v16 = vpop.eup %573 }
 0x185   : > { %v359_v17 = vmul.f32 %v574_v16, %v350_v11 }
 0x187   : > { %540 = vmatpush3.msk.msra.mxu1 %vm267_vm0, %v359_v17 }
 0x188   : > { %542 = vmatmul.mubr.msk.f32.vlgmr.msra.gmra.mxu1 %vm276_vm2, %v360_v18 }
 0x248   : > { %v434_v20 = vpop.f32.mrf.mxu1 }
 0x249   : > { %v435_v21 = vadd.f32 %v434_v20, %v361_v19 }
 0x24a   : > { %v543_v22 = vpop.f32.mrf.mxu1 }
 0x24b   : > { %v526_v23 = vmul.f32 -1.442695, %v435_v21 }
 0x24d   : > { %575 = vpow2.f32 %v526_v23 }
 0x25a   : > { %v576_v24 = vpop.eup %575 }
 0x25b   : > { %v441_v25 = vadd.f32 1.0, %v576_v24 }
 0x25d   : > { %577 = vrcp.f32 %v441_v25 }
 0x26a   : > { %v578_v26 = vpop.eup %577 }
 0x26b   : > { %445 = vst.msk [vmem:[%s250_s12] sm:$0xf] %vm444_vm3, %v578_v26 }
 0x26c PF: > { %s15_s20 = sadd.s32 1, %s601_s20   ;;  %s696_s18 = smov %s597_s19 }
 0x26d   : > { %p12_p5 = scmp.ge.s32.totalorder %s15_s20, 4   ;;  %s697_s19 = smov %s699_s21 }
 0x26f   :  { %14 = sbr.rel (!%p12_p5) target bundleno = 2 (0x2), region = 78 }

</bundles_post_ra>
